<compile_context>
chip_gen: v6e
topology: v6e:2x2x1
jax: 0.10.0
libtpu: 0.0.40
codegen_flags: <defaults>
</compile_context>

<pallas_src>
import functools

import jax
import jax.numpy as jnp
from jax.experimental import pallas as pl
from jax.experimental.pallas import tpu as pltpu


def _round_up(x, m):
    return (x + m - 1) // m * m


def _fused_head_kernel(x_ref, w_ref, b_ref, o_ref):
    """out = x @ W_fused + b_fused  (both heads in one MXU pass).

    x_ref: (TN, C)   RoI feature tile
    w_ref: (C, Wp)   fused, transposed, lane-padded weights (resident in VMEM)
    b_ref: (1, Wp)   fused, lane-padded f32 bias (resident in VMEM)
    o_ref: (TN, Wp)  fused output tile (scores | bbox | pad) — lane-dense store
    """
    acc = jnp.dot(x_ref[...], w_ref[...], preferred_element_type=jnp.float32)
    o_ref[...] = (acc + b_ref[...]).astype(o_ref.dtype)


def fuse_predictor_params(w_cls, b_cls, w_bbox, b_bbox,
                          compute_dtype=jnp.float32):
    """Pre-bake the static fused weight layout ONCE (not per forward call).

    PyTorch layout in:  w_cls (K, C), w_bbox (4K, C), biases (K,), (4K,).
    Returns:
        w_fused (C, Wp)  transposed + concatenated + zero-padded to Wp = ceil128(K + 4K)
        b_fused (1, Wp)  f32 bias, zero-padded
        k, k4            logical output widths (for slicing the fused slab)
    """
    k = w_cls.shape[0]
    k4 = w_bbox.shape[0]
    w = k + k4
    w_pad = _round_up(w, 128)
    w_fused = jnp.concatenate([w_cls, w_bbox], axis=0).T.astype(compute_dtype)
    w_fused = jnp.pad(w_fused, ((0, 0), (0, w_pad - w)))            # (C, Wp)
    b_fused = jnp.concatenate([b_cls, b_bbox], axis=0).astype(jnp.float32)
    b_fused = jnp.pad(b_fused, (0, w_pad - w)).reshape(1, w_pad)    # (1, Wp)
    return w_fused, b_fused, k, k4


@functools.partial(jax.jit, static_argnames=("num_classes", "block_n"))
def fast_rcnn_predictor(x, w_fused, b_fused, num_classes, *, block_n=256):
    """Forward of FastRCNNPredictor with pre-fused params.

    x:        (N, C) or (N, C, 1, 1)
    w_fused:  (C, Wp)   from fuse_predictor_params
    b_fused:  (1, Wp)
    returns:  scores (N, num_classes) f32, bbox_deltas (N, 4*num_classes) f32
    """
    if x.ndim == 4:
        assert x.shape[2] == 1 and x.shape[3] == 1, \
            "expected spatial dims [1, 1] for 4-D input"
    x2 = x.reshape(x.shape[0], -1)                      # flatten(start_dim=1)

    n, c = x2.shape
    c_w, w_pad = w_fused.shape
    assert c == c_w, "in_channels mismatch between x and fused weights"

    compute_dtype = w_fused.dtype
    x2 = x2.astype(compute_dtype)

    # Tile the batch dimension (multiple of 8); pad N so the grid divides it.
    tn = max(8, min(_round_up(block_n, 8), _round_up(n, 8)))
    n_pad = _round_up(n, tn)
    if n_pad != n:
        x2 = jnp.pad(x2, ((0, n_pad - n), (0, 0)))
    grid = (n_pad // tn,)

    itemsize = jnp.dtype(compute_dtype).itemsize
    cost = pl.CostEstimate(
        flops=2 * n_pad * c * w_pad,
        transcendentals=0,
        bytes_accessed=(n_pad * c * itemsize             # x
                        + c * w_pad * itemsize           # fused weights
                        + w_pad * 4                      # bias
                        + n_pad * w_pad * 4),            # fused output
    )

    out = pl.pallas_call(
        _fused_head_kernel,
        out_shape=jax.ShapeDtypeStruct((n_pad, w_pad), jnp.float32),
        grid_spec=pltpu.PrefetchScalarGridSpec(
            num_scalar_prefetch=0,
            grid=grid,
            in_specs=[
                pl.BlockSpec((tn, c), lambda i: (i, 0)),       # x tile (pipelined)
                pl.BlockSpec((c, w_pad), lambda i: (0, 0)),    # weights (resident)
                pl.BlockSpec((1, w_pad), lambda i: (0, 0)),    # bias (resident)
            ],
            out_specs=pl.BlockSpec((tn, w_pad), lambda i: (i, 0)),
        ),
        compiler_params=pltpu.CompilerParams(
            dimension_semantics=("parallel",),   # shard RoI tiles across TCs (v7x)
            vmem_limit_bytes=64 << 20,           # headroom for resident weights + tiles
        ),
        cost_estimate=cost,
    )(x2, w_fused, b_fused)

    # Slice the logical outputs out of the lane-padded fused slab.
    scores = out[:n, :num_classes]
    bbox_deltas = out[:n, num_classes:num_classes + 4 * num_classes]
    return scores, bbox_deltas


def init_params(key, in_channels, num_classes):
    """Deterministic init mimicking nn.Linear default (uniform +-1/sqrt(fan_in))."""
    k1, k2, k3, k4 = jax.random.split(key, 4)
    bound = 1.0 / jnp.sqrt(jnp.float32(in_channels))
    w_cls = jax.random.uniform(k1, (num_classes, in_channels),
                               jnp.float32, -bound, bound)
    b_cls = jax.random.uniform(k2, (num_classes,), jnp.float32, -bound, bound)
    w_bbox = jax.random.uniform(k3, (num_classes * 4, in_channels),
                                jnp.float32, -bound, bound)
    b_bbox = jax.random.uniform(k4, (num_classes * 4,),
                                jnp.float32, -bound, bound)
    return w_cls, b_cls, w_bbox, b_bbox


if __name__ == "__main__":
    key = jax.random.PRNGKey(0)
    kx, kp = jax.random.split(key)

    batch = 8            # number of RoIs
    in_channels = 32
    num_classes = 8      # including background

    # 4-D input (N, C, 1, 1), exactly as the PyTorch module allows.
    x = jax.random.normal(kx, (batch, in_channels, 1, 1), jnp.float32)
    w_cls, b_cls, w_bbox, b_bbox = init_params(kp, in_channels, num_classes)

    # Bake the fused / transposed / padded layout once (static weights).
    w_fused, b_fused, k, k4 = fuse_predictor_params(w_cls, b_cls, w_bbox, b_bbox)

    scores, bbox_deltas = fast_rcnn_predictor(x, w_fused, b_fused, num_classes)
    jax.block_until_ready((scores, bbox_deltas))

    # Reference check against plain JAX (same semantics as the PyTorch forward).
    x_flat = x.reshape(batch, -1)
    ref_scores = x_flat @ w_cls.T + b_cls
    ref_bbox = x_flat @ w_bbox.T + b_bbox
    assert scores.shape == (batch, num_classes)
    assert bbox_deltas.shape == (batch, num_classes * 4)
    assert jnp.allclose(scores, ref_scores, atol=1e-5, rtol=1e-5)
    assert jnp.allclose(bbox_deltas, ref_bbox, atol=1e-5, rtol=1e-5)

    print("KERNEL_OK")
</pallas_src>

<mosaic_0001>
module attributes {stable_mosaic.version = 11 : i64} {
  func.func @_fused_head_kernel(%arg0: i32, %arg1: memref<8x32xf32, #tpu.memory_space<vmem>>, %arg2: memref<32x128xf32, #tpu.memory_space<vmem>>, %arg3: memref<1x128xf32, #tpu.memory_space<vmem>>, %arg4: memref<8x128xf32, #tpu.memory_space<vmem>>) attributes {dimension_semantics = [#tpu.dimension_semantics<parallel>], iteration_bounds = array<i64: 1>, scalar_prefetch = 0 : i64, scratch_operands = 0 : i64, tpu.core_type = #tpu.core_type<tc>, window_params = [{transform_indices = @transform_0, window_bounds = array<i64: 8, 32>}, {pipeline_mode = #tpu.pipeline_mode<synchronous>, transform_indices = @transform_1, window_bounds = array<i64: 32, 128>}, {pipeline_mode = #tpu.pipeline_mode<synchronous>, transform_indices = @transform_2, window_bounds = array<i64: 1, 128>}, {transform_indices = @transform_3, window_bounds = array<i64: 8, 128>}]} {
    %c0 = arith.constant 0 : index
    %c0_0 = arith.constant 0 : index
    %0 = vector.load %arg1[%c0, %c0_0] : memref<8x32xf32, #tpu.memory_space<vmem>>, vector<8x32xf32>
    %c0_1 = arith.constant 0 : index
    %c0_2 = arith.constant 0 : index
    %1 = vector.load %arg2[%c0_1, %c0_2] : memref<32x128xf32, #tpu.memory_space<vmem>>, vector<32x128xf32>
    %cst = arith.constant dense<0.000000e+00> : vector<8x128xf32>
    %2 = tpu.matmul %0, %1, %cst {dimension_numbers = #tpu.dot_dimension_numbers<[1], [0], [0], [1], [0, 0, 1, 1], [], []>} : vector<8x32xf32>, vector<32x128xf32>, vector<8x128xf32> -> vector<8x128xf32>
    %c0_3 = arith.constant 0 : index
    %c0_4 = arith.constant 0 : index
    %3 = vector.load %arg3[%c0_3, %c0_4] : memref<1x128xf32, #tpu.memory_space<vmem>>, vector<1x128xf32>
    %4 = vector.broadcast %3 : vector<1x128xf32> to vector<8x128xf32>
    %5 = arith.addf %2, %4 : vector<8x128xf32>
    %c0_5 = arith.constant 0 : index
    %c0_6 = arith.constant 0 : index
    %6 = vector.load %arg4[%c0_5, %c0_6] : memref<8x128xf32, #tpu.memory_space<vmem>>, vector<8x128xf32>
    tpu.vector_store %arg4[%c0_5, %c0_6], %5 {strides = array<i32>} : memref<8x128xf32, #tpu.memory_space<vmem>>, vector<8x128xf32>,
    return
  }
  func.func @transform_0(%arg0: i32) -> (i32, i32) {
    %c0_i32 = arith.constant 0 : i32
    %c0_i32_0 = arith.constant 0 : i32
    return %arg0, %c0_i32 : i32, i32
  }
  func.func @transform_1(%arg0: i32) -> (i32, i32) {
    %c0_i32 = arith.constant 0 : i32
    %c0_i32_0 = arith.constant 0 : i32
    %c0_i32_1 = arith.constant 0 : i32
    return %c0_i32, %c0_i32_0 : i32, i32
  }
  func.func @transform_2(%arg0: i32) -> (i32, i32) {
    %c0_i32 = arith.constant 0 : i32
    %c0_i32_0 = arith.constant 0 : i32
    %c0_i32_1 = arith.constant 0 : i32
    return %c0_i32, %c0_i32_0 : i32, i32
  }
  func.func @transform_3(%arg0: i32) -> (i32, i32) {
    %c0_i32 = arith.constant 0 : i32
    %c0_i32_0 = arith.constant 0 : i32
    return %arg0, %c0_i32 : i32, i32
  }
}

</mosaic_0001>

<bundles_post_ra>
// kernel: fast_rcnn_predictor.1
= control target key start
LH: loop header
LB: loop body
LE: loop exit
PB: predicated region body
PF: predicated region fallthrough
CT: control target
= control target key end

     0   :  { %8 = vsyncpa [#allocation3], 0  ;;  %s239_s0 = inlined_call_operand.hbm [shape: f32[8,32], index: 0, kind: input, shape index: {}]   ;;  %s240_s1 = inlined_call_operand.hbm [shape: f32[32,128], index: 1, kind: input, shape index: {}]   ;;  %s241_s2 = inlined_call_operand.vmem [shape: f32[1,128], index: 2, kind: input, shape index: {}]   ;;  %s242_s3 = inlined_call_operand.vmem [shape: f32[8,128], index: 3, kind: output, shape index: {}]  }
   0x1   :  { %9 = vsyncpa [#allocation5], 0  ;;  %s201_s12 = smov [#allocation2]   ;;  %s202_s14 = smov [#allocation4]  }
   0x2   :  { %s16_s13 = sshll.u32 %s201_s12, 4  ;;  %s25_s15 = sshll.u32 %s202_s14, 4  ;;  %s17_s13 = int_to_ptr.vmem [resolvable:$true] %s16_s13  ;;  %s26_s15 = int_to_ptr.vmem [resolvable:$true] %s25_s15 }
   0x3   :  { %s165_s16 = scalar_lea.vmem %s17_s13, 128  ;;  %p170_p1 = scmp.lt.s32.totalorder %s17_s13, %s17_s13 }
   0x4   :  { %p166_p0 = scmp.ne.s32.totalorder %s17_s13, %s165_s16  ;;  %p171_p2 = scmp.lt.s32.totalorder %s165_s16, %s165_s16 }
   0x6   :  { %p172_p3 = por %p171_p2, %p170_p1 }
   0x8   :  { %p173_p4 = pnand %p172_p3, %p166_p0 }
   0xa   :  { %176 = shalt.err (!%p173_p4)
}
   0xb   :  { %19 = dma.hbm_to_vmem [thread:$0]  %s239_s0, 128, %s17_s13, [#allocation3]  }
   0xc   :  { %s185_s19 = scalar_lea.vmem %s26_s15, 512  ;;  %p190_p6 = scmp.lt.s32.totalorder %s26_s15, %s26_s15 }
   0xd   :  { %p186_p5 = scmp.ne.s32.totalorder %s26_s15, %s185_s19  ;;  %p191_p7 = scmp.lt.s32.totalorder %s185_s19, %s185_s19 }
   0xf   :  { %p192_p8 = por %p191_p7, %p190_p6 }
  0x11   :  { %p193_p9 = pnand %p192_p8, %p186_p5 }
  0x13   :  { %196 = shalt.err (!%p193_p9)
}
  0x14   :  { %s203_s20 = smov 128   ;;  %s204_s21 = smov 8  }
  0x15   :  { %31 = dma.hbm_to_vmem [thread:$0]  %s240_s1, 512, %s26_s15, [#allocation5], %s203_s20, %s203_s20, %s204_s21  }
  0x16   :  { %197 = dma.done.wait [#allocation3], 128  }
  0x17   :  { %198 = vsyncadd [#allocation3], 4294967168 }
  0x18   :  { %199 = dma.done.wait [#allocation5], 512  }
  0x19   :  { %200 = vsyncadd [#allocation5], 4294966784  ;;  %v205_v0 = vmov 0.0   ;;  %vm206_vm0 = vmmov 0   ;;  %v44_v1 = vld [vmem:[#allocation4 + $0x18] sm:$0xff]  ;;  %v43_v2 = vld [vmem:[#allocation4 + $0x10] sm:$0xff] }
  0x1a   :  { %140 = vmatprep.subr.mxu0 %v205_v0  ;;  %148 = vmatprep.mubr.msk.f32.mxu0 %vm206_vm0, %v205_v0  ;;  %v42_v3 = vld [vmem:[#allocation4 + $0x8] sm:$0xff]  ;;  %v41_v4 = vld [vmem:[#allocation4] sm:$0xff]  ;;  %v40_v5 = vld [vmem:[#allocation2] sm:$0xff]  ;;  %vm52_vm1 = vcmask 261120  }
  0x1b   :  { %141 = vmatpush3.msra.mxu0 %v44_v1  ;;  %v133_v6 = vld [vmem:[%s241_s2] ss:$0 sm:$0xff] }
  0x1c   :  { %142 = vmatprep.subr.mxu0 %v205_v0 }
  0x1d   :  { %143 = vmatpush3.msra.mxu0 %v43_v2 }
  0x1e   :  { %144 = vmatprep.subr.mxu0 %v205_v0 }
  0x1f   :  { %145 = vmatpush3.msra.mxu0 %v42_v3 }
  0x20   :  { %146 = vmatprep.subr.mxu0 %v205_v0 }
  0x21   :  { %147 = vmatpush3.msra.mxu0 %v41_v4 }
  0x22   :  { %149 = vmatmul.mubr.msk.f32.vlgmr.msra.gmra.mxu0 %vm52_vm1, %v40_v5 }
  0xe2   :  { %v122_v7 = vpop.f32.mrf.mxu0 }
  0xe3   :  { %v123_v8 = vadd.f32 %v133_v6, %v122_v7 }
  0xe4   :  { %v150_v9 = vpop.f32.mrf.mxu0 }
  0xe5   :  { %126 = vst [vmem:[%s242_s3] sm:$0xff] %v123_v8 }
  0xe6   :  { %131 = vsyncpa [#allocation3], 1 }
  0xe7   :  { %132 = vsyncpa [#allocation5], 1 }

</bundles_post_ra>
